<compile_context>
chip_gen: v5e
topology: v5e:2x2
jax: 0.10.0
libtpu: 0.0.40
codegen_flags: <defaults>
</compile_context>

<pallas_src>
import functools

import jax
import jax.numpy as jnp
from jax import lax
from jax.experimental import pallas as pl
from jax.experimental.pallas import tpu as pltpu


def _round_up(x, m):
    return (x + m - 1) // m * m


def _nt_xent_kernel(zrow_ref, zcol_ref, zpos_ref, out_ref, m_scr, l_scr, *,
                    inv_temp, n_valid):
    """Grid = (row_tiles, col_tiles); the col axis is an online-lse reduction."""
    i = pl.program_id(0)
    k = pl.program_id(1)
    tm = zrow_ref.shape[0]
    tn = zcol_ref.shape[0]

    @pl.when(k == 0)
    def _init():
        m_scr[...] = jnp.full_like(m_scr, -1e30)
        l_scr[...] = jnp.zeros_like(l_scr)

    # Fold 1/temperature into the (already unit-norm) row operand: O(TM*D) VPU
    # work per tile, negligible next to the O(TM*TN*D) MXU work.
    rs = zrow_ref[...] * inv_temp                                     # (TM, D)
    # Similarity tile on the MXU; contract the last dim of both operands.
    s = lax.dot_general(rs, zcol_ref[...], (((1,), (1,)), ((), ())),
                        preferred_element_type=jnp.float32)           # (TM, TN)

    # One fused mask per tile: self-similarity (diagonal) + padded columns.
    row_ids = i * tm + lax.broadcasted_iota(jnp.int32, (tm, 1), 0)    # (TM, 1)
    col_ids = k * tn + lax.broadcasted_iota(jnp.int32, (1, tn), 1)    # (1, TN)
    invalid = (col_ids == row_ids) | (col_ids >= n_valid)
    s = jnp.where(invalid, -1e30, s)    # exp(-1e30 - m) == 0 downstream.

    # Online logsumexp across column tiles.
    m_prev = m_scr[...]                                               # (TM, 1)
    m_new = jnp.maximum(m_prev, jnp.max(s, axis=-1, keepdims=True))
    l_scr[...] = (l_scr[...] * jnp.exp(m_prev - m_new)
                  + jnp.sum(jnp.exp(s - m_new), axis=-1, keepdims=True))
    m_scr[...] = m_new

    @pl.when(k == pl.num_programs(1) - 1)
    def _finalize():
        lse = m_scr[...] + jnp.log(l_scr[...])                        # (TM, 1)
        # Positive logit: row-wise dot with the partner row (O(TM*D)).
        pos = jnp.sum((rs * zpos_ref[...]).astype(jnp.float32),
                      axis=-1, keepdims=True)                         # (TM, 1)
        valid_row = row_ids < n_valid
        out_ref[...] = jnp.where(valid_row, lse - pos, 0.0)


def nt_xent(z_i, z_j, temperature, *, block=256):
    """NT-Xent loss. z_i, z_j: (batch_size * world_size, D). Returns a scalar."""
    z = jnp.concatenate([z_i, z_j], axis=0)           # concat in the wrapper
    n, d = z.shape
    bw = n // 2                                       # batch_size * world_size

    # Cosine pre-normalization. PyTorch clamps ||a||*||b|| at 1e-8; clamping
    # each squared norm at 1e-8 matches except when exactly one embedding is
    # (near) zero.
    zf = z.astype(jnp.float32)
    sq = jnp.sum(zf * zf, axis=-1, keepdims=True)
    zn = (zf * lax.rsqrt(jnp.maximum(sq, 1e-8))).astype(z.dtype)
    # Partner rows: the positive pair of row i sits at row (i + bw) mod n.
    zp = jnp.roll(zn, shift=-bw, axis=0)

    # Tile choice: MXU/(8,128)-friendly 256; tiny inputs get a single full
    # block rounded up to the 8-sublane granule.
    tile = block if n >= block else _round_up(n, 8)
    n_pad = _round_up(n, tile)
    if n_pad != n:
        zn = jnp.pad(zn, ((0, n_pad - n), (0, 0)))
        zp = jnp.pad(zp, ((0, n_pad - n), (0, 0)))
    g = n_pad // tile

    kernel = functools.partial(_nt_xent_kernel,
                               inv_temp=float(1.0 / temperature), n_valid=n)
    itemsize = jnp.dtype(zn.dtype).itemsize
    cost = pl.CostEstimate(
        flops=2 * n_pad * n_pad * d,
        transcendentals=n_pad * n_pad,
        bytes_accessed=(g + 2) * n_pad * d * itemsize + 4 * n_pad,
    )

    per_row = pl.pallas_call(
        kernel,
        out_shape=jax.ShapeDtypeStruct((n_pad, 1), jnp.float32),
        grid_spec=pltpu.PrefetchScalarGridSpec(
            num_scalar_prefetch=0,
            grid=(g, g),
            in_specs=[
                pl.BlockSpec((tile, d), lambda i, k: (i, 0)),  # query rows
                pl.BlockSpec((tile, d), lambda i, k: (k, 0)),  # key rows (stream)
                pl.BlockSpec((tile, d), lambda i, k: (i, 0)),  # positive partners
            ],
            out_specs=pl.BlockSpec((tile, 1), lambda i, k: (i, 0)),
            scratch_shapes=[
                pltpu.VMEM((tile, 1), jnp.float32),   # running max
                pltpu.VMEM((tile, 1), jnp.float32),   # running sum of exp
            ],
        ),
        compiler_params=pltpu.CompilerParams(
            dimension_semantics=("parallel", "arbitrary"),
            vmem_limit_bytes=32 * 1024 * 1024,
        ),
        cost_estimate=cost,
    )(zn, zn, zp)

    return jnp.sum(per_row) / jnp.float32(n)


def nt_xent_ref(z_i, z_j, temperature):
    """Plain-JAX reference mirroring the PyTorch module."""
    z = jnp.concatenate([z_i, z_j], axis=0).astype(jnp.float32)
    n = z.shape[0]
    bw = n // 2
    norm = jnp.linalg.norm(z, axis=-1, keepdims=True)
    sim = (z @ z.T) / jnp.maximum(norm * norm.T, 1e-8) / temperature
    row = jnp.arange(n)[:, None]
    col = jnp.arange(n)[None, :]
    sim_nd = jnp.where(row == col, -jnp.inf, sim)
    lse = jax.scipy.special.logsumexp(sim_nd, axis=-1)
    pos = sim[jnp.arange(n), (jnp.arange(n) + bw) % n]
    return jnp.sum(lse - pos) / n


if __name__ == "__main__":
    key = jax.random.PRNGKey(0)
    k1, k2, k3, k4 = jax.random.split(key, 4)

    # Small case (single tile): batch=4, world_size=1, dim=32 -> N=8.
    z_i = jax.random.normal(k1, (4, 32), dtype=jnp.float32)
    z_j = jax.random.normal(k2, (4, 32), dtype=jnp.float32)
    loss = jax.block_until_ready(nt_xent(z_i, z_j, 0.5))
    ref = jax.block_until_ready(nt_xent_ref(z_i, z_j, 0.5))
    assert jnp.allclose(loss, ref, rtol=1e-3, atol=1e-3), (loss, ref)

    # Larger case exercising the tiled grid + padding: N=320 -> 2x2 grid of 256.
    z_i2 = jax.random.normal(k3, (160, 64), dtype=jnp.float32)
    z_j2 = jax.random.normal(k4, (160, 64), dtype=jnp.float32)
    loss2 = jax.block_until_ready(nt_xent(z_i2, z_j2, 0.1))
    ref2 = jax.block_until_ready(nt_xent_ref(z_i2, z_j2, 0.1))
    assert jnp.allclose(loss2, ref2, rtol=1e-3, atol=1e-3), (loss2, ref2)

    print("KERNEL_OK")
</pallas_src>

<mosaic_0001>
module attributes {stable_mosaic.version = 11 : i64} {
  func.func @_nt_xent_kernel(%arg0: i32, %arg1: i32, %arg2: memref<8x32xf32, #tpu.memory_space<vmem>>, %arg3: memref<8x32xf32, #tpu.memory_space<vmem>>, %arg4: memref<8x32xf32, #tpu.memory_space<vmem>>, %arg5: memref<8x1xf32, #tpu.memory_space<vmem>>, %arg6: memref<8x1xf32, #tpu.memory_space<vmem>>, %arg7: memref<8x1xf32, #tpu.memory_space<vmem>>) attributes {dimension_semantics = [#tpu.dimension_semantics<parallel>, #tpu.dimension_semantics<arbitrary>], iteration_bounds = array<i64: 1, 1>, scalar_prefetch = 0 : i64, scratch_operands = 2 : i64, tpu.core_type = #tpu.core_type<tc>, window_params = [{transform_indices = @transform_0, window_bounds = array<i64: 8, 32>}, {transform_indices = @transform_1, window_bounds = array<i64: 8, 32>}, {transform_indices = @transform_2, window_bounds = array<i64: 8, 32>}, {transform_indices = @transform_3, window_bounds = array<i64: 8, 1>}]} {
    %c0_i32 = arith.constant 0 : i32
    %0 = arith.cmpi eq, %arg1, %c0_i32 : i32
    %1 = arith.extui %0 : i1 to i32
    %c0_i32_0 = arith.constant 0 : i32
    %2 = arith.cmpi ne, %1, %c0_i32_0 : i32
    scf.if %2 {
      %cst_20 = arith.constant -1.000000e+30 : f32
      %44 = vector.broadcast %cst_20 : f32 to vector<8x1xf32>
      %c0_21 = arith.constant 0 : index
      %c0_22 = arith.constant 0 : index
      %45 = vector.load %arg6[%c0_21, %c0_22] : memref<8x1xf32, #tpu.memory_space<vmem>>, vector<8x1xf32>
      tpu.vector_store %arg6[%c0_21, %c0_22], %44 {strides = array<i32>} : memref<8x1xf32, #tpu.memory_space<vmem>>, vector<8x1xf32>,
      %cst_23 = arith.constant 0.000000e+00 : f32
      %46 = vector.broadcast %cst_23 : f32 to vector<8x1xf32>
      %c0_24 = arith.constant 0 : index
      %c0_25 = arith.constant 0 : index
      %47 = vector.load %arg7[%c0_24, %c0_25] : memref<8x1xf32, #tpu.memory_space<vmem>>, vector<8x1xf32>
      tpu.vector_store %arg7[%c0_24, %c0_25], %46 {strides = array<i32>} : memref<8x1xf32, #tpu.memory_space<vmem>>, vector<8x1xf32>,
    } else {
    }
    %c0 = arith.constant 0 : index
    %c0_1 = arith.constant 0 : index
    %3 = vector.load %arg2[%c0, %c0_1] : memref<8x32xf32, #tpu.memory_space<vmem>>, vector<8x32xf32>
    %cst = arith.constant 2.000000e+00 : f32
    %4 = vector.broadcast %cst : f32 to vector<8x32xf32>
    %5 = arith.mulf %3, %4 : vector<8x32xf32>
    %c0_2 = arith.constant 0 : index
    %c0_3 = arith.constant 0 : index
    %6 = vector.load %arg3[%c0_2, %c0_3] : memref<8x32xf32, #tpu.memory_space<vmem>>, vector<8x32xf32>
    %cst_4 = arith.constant dense<0.000000e+00> : vector<8x8xf32>
    %7 = tpu.matmul %5, %6, %cst_4 {dimension_numbers = #tpu.dot_dimension_numbers<[1], [1], [0], [0], [0, 0, 1, 0], [], []>} : vector<8x32xf32>, vector<8x32xf32>, vector<8x8xf32> -> vector<8x8xf32>
    %c8_i32 = arith.constant 8 : i32
    %8 = arith.muli %arg0, %c8_i32 : i32
    %9 = tpu.iota {dimensions = array<i32: 0>} : vector<8x1xi32>
    %10 = vector.broadcast %8 : i32 to vector<8x1xi32>
    %11 = arith.addi %10, %9 : vector<8x1xi32>
    %c8_i32_5 = arith.constant 8 : i32
    %12 = arith.muli %arg1, %c8_i32_5 : i32
    %13 = tpu.iota {dimensions = array<i32: 1>} : vector<1x8xi32>
    %14 = vector.broadcast %12 : i32 to vector<1x8xi32>
    %15 = arith.addi %14, %13 : vector<1x8xi32>
    %16 = vector.broadcast %15 : vector<1x8xi32> to vector<8x8xi32>
    %17 = vector.broadcast %11 : vector<8x1xi32> to vector<8x8xi32>
    %18 = arith.cmpi eq, %16, %17 : vector<8x8xi32>
    %c8_i32_6 = arith.constant 8 : i32
    %19 = vector.broadcast %c8_i32_6 : i32 to vector<1x8xi32>
    %20 = arith.cmpi sge, %15, %19 : vector<1x8xi32>
    %21 = vector.broadcast %20 : vector<1x8xi1> to vector<8x8xi1>
    %22 = arith.ori %18, %21 : vector<8x8xi1>
    %cst_7 = arith.constant -1.000000e+30 : f32
    %23 = vector.broadcast %cst_7 : f32 to vector<8x8xf32>
    %24 = arith.select %22, %23, %7 : vector<8x8xi1>, vector<8x8xf32>
    %c0_8 = arith.constant 0 : index
    %c0_9 = arith.constant 0 : index
    %25 = vector.load %arg6[%c0_8, %c0_9] : memref<8x1xf32, #tpu.memory_space<vmem>>, vector<8x1xf32>
    %cst_10 = arith.constant dense<0xFF800000> : vector<8xf32>
    %26 = vector.multi_reduction <maximumf>, %24, %cst_10 [1] : vector<8x8xf32> to vector<8xf32>
    %27 = vector.shape_cast %26 : vector<8xf32> to vector<8x1xf32>
    %28 = arith.maximumf %25, %27 : vector<8x1xf32>
    %c0_11 = arith.constant 0 : index
    %c0_12 = arith.constant 0 : index
    %29 = vector.load %arg7[%c0_11, %c0_12] : memref<8x1xf32, #tpu.memory_space<vmem>>, vector<8x1xf32>
    %30 = arith.subf %25, %28 : vector<8x1xf32>
    %31 = math.exp %30 : vector<8x1xf32>
    %32 = arith.mulf %29, %31 : vector<8x1xf32>
    %33 = vector.broadcast %28 : vector<8x1xf32> to vector<8x8xf32>
    %34 = arith.subf %24, %33 : vector<8x8xf32>
    %35 = math.exp %34 : vector<8x8xf32>
    %cst_13 = arith.constant dense<0.000000e+00> : vector<8xf32>
    %36 = vector.multi_reduction <add>, %35, %cst_13 [1] : vector<8x8xf32> to vector<8xf32>
    %37 = vector.shape_cast %36 : vector<8xf32> to vector<8x1xf32>
    %38 = arith.addf %32, %37 : vector<8x1xf32>
    %c0_14 = arith.constant 0 : index
    %c0_15 = arith.constant 0 : index
    %39 = vector.load %arg7[%c0_14, %c0_15] : memref<8x1xf32, #tpu.memory_space<vmem>>, vector<8x1xf32>
    tpu.vector_store %arg7[%c0_14, %c0_15], %38 {strides = array<i32>} : memref<8x1xf32, #tpu.memory_space<vmem>>, vector<8x1xf32>,
    %c0_16 = arith.constant 0 : index
    %c0_17 = arith.constant 0 : index
    %40 = vector.load %arg6[%c0_16, %c0_17] : memref<8x1xf32, #tpu.memory_space<vmem>>, vector<8x1xf32>
    tpu.vector_store %arg6[%c0_16, %c0_17], %28 {strides = array<i32>} : memref<8x1xf32, #tpu.memory_space<vmem>>, vector<8x1xf32>,
    %c0_i32_18 = arith.constant 0 : i32
    %41 = arith.cmpi eq, %arg1, %c0_i32_18 : i32
    %42 = arith.extui %41 : i1 to i32
    %c0_i32_19 = arith.constant 0 : i32
    %43 = arith.cmpi ne, %42, %c0_i32_19 : i32
    scf.if %43 {
      %c0_20 = arith.constant 0 : index
      %c0_21 = arith.constant 0 : index
      %44 = vector.load %arg6[%c0_20, %c0_21] : memref<8x1xf32, #tpu.memory_space<vmem>>, vector<8x1xf32>
      %c0_22 = arith.constant 0 : index
      %c0_23 = arith.constant 0 : index
      %45 = vector.load %arg7[%c0_22, %c0_23] : memref<8x1xf32, #tpu.memory_space<vmem>>, vector<8x1xf32>
      %46 = math.log %45 : vector<8x1xf32>
      %47 = arith.addf %44, %46 : vector<8x1xf32>
      %c0_24 = arith.constant 0 : index
      %c0_25 = arith.constant 0 : index
      %48 = vector.load %arg4[%c0_24, %c0_25] : memref<8x32xf32, #tpu.memory_space<vmem>>, vector<8x32xf32>
      %49 = arith.mulf %5, %48 : vector<8x32xf32>
      %cst_26 = arith.constant dense<0.000000e+00> : vector<8xf32>
      %50 = vector.multi_reduction <add>, %49, %cst_26 [1] : vector<8x32xf32> to vector<8xf32>
      %51 = vector.shape_cast %50 : vector<8xf32> to vector<8x1xf32>
      %c8_i32_27 = arith.constant 8 : i32
      %52 = vector.broadcast %c8_i32_27 : i32 to vector<8x1xi32>
      %53 = arith.cmpi slt, %11, %52 : vector<8x1xi32>
      %54 = arith.subf %47, %51 : vector<8x1xf32>
      %cst_28 = arith.constant 0.000000e+00 : f32
      %55 = vector.broadcast %cst_28 : f32 to vector<8x1xf32>
      %56 = arith.select %53, %54, %55 : vector<8x1xi1>, vector<8x1xf32>
      %c0_29 = arith.constant 0 : index
      %c0_30 = arith.constant 0 : index
      %57 = vector.load %arg5[%c0_29, %c0_30] : memref<8x1xf32, #tpu.memory_space<vmem>>, vector<8x1xf32>
      tpu.vector_store %arg5[%c0_29, %c0_30], %56 {strides = array<i32>} : memref<8x1xf32, #tpu.memory_space<vmem>>, vector<8x1xf32>,
    } else {
    }
    return
  }
  func.func @transform_0(%arg0: i32, %arg1: i32) -> (i32, i32) {
    %c0_i32 = arith.constant 0 : i32
    %c0_i32_0 = arith.constant 0 : i32
    return %arg0, %c0_i32 : i32, i32
  }
  func.func @transform_1(%arg0: i32, %arg1: i32) -> (i32, i32) {
    %c0_i32 = arith.constant 0 : i32
    %c0_i32_0 = arith.constant 0 : i32
    return %arg1, %c0_i32 : i32, i32
  }
  func.func @transform_2(%arg0: i32, %arg1: i32) -> (i32, i32) {
    %c0_i32 = arith.constant 0 : i32
    %c0_i32_0 = arith.constant 0 : i32
    return %arg0, %c0_i32 : i32, i32
  }
  func.func @transform_3(%arg0: i32, %arg1: i32) -> (i32, i32) {
    %c0_i32 = arith.constant 0 : i32
    %c0_i32_0 = arith.constant 0 : i32
    return %arg0, %c0_i32 : i32, i32
  }
}

</mosaic_0001>

<bundles_post_ra>
// kernel: tpu_custom_call.1
= control target key start
LH: loop header
LB: loop body
LE: loop exit
PB: predicated region body
PF: predicated region fallthrough
CT: control target
= control target key end

     0   :  { %8 = vsyncpa [#allocation5], 0  ;;  %s296_s0 = inlined_call_operand.hbm [shape: f32[8,32], index: 0, kind: input, shape index: {}]   ;;  %s297_s1 = inlined_call_operand.hbm [shape: f32[8,32], index: 1, kind: input, shape index: {}]   ;;  %s298_s2 = inlined_call_operand.hbm [shape: f32[8,32], index: 2, kind: input, shape index: {}]   ;;  %s299_s3 = inlined_call_operand.vmem [shape: f32[8,1], index: 3, kind: output, shape index: {}]  }
   0x1   :  { %9 = vsyncpa [#allocation7], 0  ;;  %s26_s14 = sshll.u32 %s297_s1, 4  ;;  %s248_s15 = smov [#allocation6]   ;;  %s27_s14 = int_to_ptr.hbm [resolvable:$true] %s26_s14 }
   0x2   :  { %s28_s16 = sshll.u32 %s248_s15, 4  ;;  %s15_s19 = sshll.u32 %s296_s0, 4  ;;  %s29_s16 = int_to_ptr.vmem [resolvable:$true] %s28_s16  ;;  %s16_s19 = int_to_ptr.hbm [resolvable:$true] %s15_s19 }
   0x3   :  { %31 = dma.hbm_to_vmem [thread:$0]  %s27_s14, 128, %s29_s16, [#allocation7]  }
   0x4   :  { %s249_s20 = smov [#allocation4]   ;;  %s37_s24 = sshll.u32 %s298_s2, 4  ;;  %s38_s24 = int_to_ptr.hbm [resolvable:$true] %s37_s24 }
   0x5   :  { %s17_s21 = sshll.u32 %s249_s20, 4  ;;  %s250_s1 = smov [#allocation8]   ;;  %s18_s21 = int_to_ptr.vmem [resolvable:$true] %s17_s21 }
   0x6   :  { %20 = dma.hbm_to_vmem [thread:$0]  %s16_s19, 128, %s18_s21, [#allocation5]  }
   0x7   :  { %s39_s25 = sshll.u32 %s250_s1, 4  ;;  %s40_s25 = int_to_ptr.vmem [resolvable:$true] %s39_s25 }
   0x8   :  { %42 = dma.hbm_to_vmem [thread:$0]  %s38_s24, 128, %s40_s25, [#allocation7]  }
   0x9   :  { %244 = dma.done.wait [#allocation5], 128  }
   0xa   :  { %245 = vsyncadd [#allocation5], 4294967168 }
   0xb   :  { %246 = dma.done.wait [#allocation7], 256  }
   0xc   :  { %247 = vsyncadd [#allocation7], 4294967040  ;;  %vm65_vm0 = vcmask 261120   ;;  %v64_v0 = vld [vmem:[#allocation6] sm:$0xff]  ;;  %v62_v1 = vld [vmem:[#allocation4] sm:$0xff]  ;;  %vm59_vm1 = vcmask 7168   ;;  %v93_v4 = vlaneseq }
   0xd   :  { %157 = vmatpush.xpose.msk.msra.mxu0 %vm65_vm0, %v64_v0  ;;  %v63_v2 = vmul.f32 2.0, %v62_v1  ;;  %v251_v3 = vmov -1e+30   ;;  %vm109_vm5 = vcmask 64512   ;;  %v252_v10 = vmov 0   ;;  %v142_v20 = vld [vmem:[#allocation8] sm:$0xff] }
   0xe   :  { %60 = vst.msk [vmem:[#allocation2] sm:$0xff] %vm59_vm1, %v251_v3  ;;  %v94_v5 = vshrl.u32 %v93_v4, 7  ;;  %v99_v6 = vand.u32 127, %v93_v4  ;;  %165 = vset.pattern.permute.xlu0 %v252_v10  ;;  %v253_v11 = vmov 0.0  }
   0xf   :  { %61 = vst.msk [vmem:[#allocation3] sm:$0xff] %vm59_vm1, %v253_v11  ;;  %v143_v22 = vmul.f32 %v142_v20, %v63_v2 }
  0x10   :  { %158 = vmatmul.msk.f32.vlgmr.msra.gmra.mxu0 %vm65_vm0, %v63_v2  ;;  %vm102_vm2 = vcmp.eq.s32.totalorder %v99_v6, %v94_v5  ;;  %vm103_vm3 = vcmp.ge.s32.totalorder %v99_v6, 8 }
  0x11   :  { %vm106_vm4 = vmor %vm102_vm2, %vm103_vm3  ;;  %v144_v23 = vsel %vm65_vm0, %v143_v22, 0.0 }
  0x15   :  { %v108_v12 = vld [vmem:[#allocation2] sm:$0xff] }
  0x16   :  { %v114_v26 = vld [vmem:[#allocation3] sm:$0xff] }
  0x8d   :  { %v89_v7 = vpop.f32.mrf.mxu0 }
  0x8e   :  { %v107_v8 = vsel %vm106_vm4, -1e+30, %v89_v7 }
  0x8f   :  { %v110_v9 = vsel %vm109_vm5, %v107_v8, -inf }
  0x90   :  { %111 = vmax.xlane.f32.xlu0 %v110_v9 }
 0x103   :  { %v112_v13 = vpop.xlane.xlu0 %111 }
 0x104   :  { %v113_v14 = vmax.f32 %v108_v12, %v112_v13 }
 0x106   :  { %v115_v15 = vsub.f32 %v108_v12, %v113_v14  ;;  %133 = vst.msk [vmem:[#allocation2] sm:$0xff] %vm59_vm1, %v113_v14  ;;  %121 = vperm.xlu0 %165, %v113_v14  }
 0x108   :  { %v116_v24 = vmul.f32 1.442695, %v115_v15 }
 0x10d   :  { %v137_v34 = vld [vmem:[#allocation2] sm:$0xff] }
 0x178   :  { %v122_v16 = vpop.permute.xlu0 %121 }
 0x179   :  { %v124_v17 = vsub.f32 %v107_v8, %v122_v16 }
 0x17b   :  { %v125_v18 = vmul.f32 1.442695, %v124_v17 }
 0x17d   :  { %166 = vpow2.f32 %v125_v18 }
 0x17e   :  { %168 = vpow2.f32 %v116_v24 }
 0x183   :  { %v167_v19 = vpop.eup %166 }
 0x184   :  { %v127_v21 = vsel %vm109_vm5, %v167_v19, 0.0  ;;  %v169_v25 = vpop.eup %168 }
 0x185   :  { %128 = vadd.xlane.f32.xlu1 %v127_v21  ;;  %v118_v27 = vmul.f32 %v169_v25, %v114_v26 }
 0x18d   :  { %145 = vadd.xlane.f32.xlu1 %v144_v23 }
 0x1f8   :  { %v129_v28 = vpop.xlane.xlu1 %128 }
 0x1f9   :  { %v130_v29 = vadd.f32 %v129_v28, %v118_v27 }
 0x1fb   :  { %132 = vst.msk [vmem:[#allocation3] sm:$0xff] %vm59_vm1, %v130_v29 }
 0x200   :  { %v146_v33 = vpop.xlane.xlu1 %145 }
 0x202   :  { %v138_v30 = vld [vmem:[#allocation3] sm:$0xff] }
 0x203   :  { %170 = vlog2.f32 %v138_v30 }
 0x209   :  { %v171_v31 = vpop.eup %170 }
 0x20a   :  { %v140_v32 = vmul.f32 0.6931472, %v171_v31 }
 0x20c   :  { %v141_v35 = vadd.f32 %v140_v32, %v137_v34 }
 0x20e   :  { %v148_v36 = vsub.f32 %v141_v35, %v146_v33 }
 0x210   :  { %150 = vst.msk [vmem:[%s299_s3] sm:$0xff] %vm59_vm1, %v148_v36 }
 0x211   :  { %155 = vsyncpa [#allocation5], 1 }
 0x212   :  { %156 = vsyncpa [#allocation7], 1 }

</bundles_post_ra>
